<compile_context>
chip_gen: v7x
topology: tpu7x:2x2x1
jax: 0.10.0
libtpu: 0.0.40
codegen_flags: <defaults>
</compile_context>

<pallas_src>
import functools

import jax
import jax.numpy as jnp
from jax.experimental import pallas as pl
from jax.experimental.pallas import tpu as pltpu


def _label_smoothing_partial_kernel(preds_ref, target_ref, out_ref, *, true_b):
    raw = preds_ref[...]                              # (TB, C), original dtype
    x = raw.astype(jnp.float32)                       # f32 working copy (cast on load)
    t = target_ref[...]                               # (TB, 1) int32
    TB, C = x.shape

    # Row-validity mask: handles the ragged final batch tile (rows >= true_b
    # contain undefined data and must not contribute to either sum).
    row = pl.program_id(0) * TB + jax.lax.broadcasted_iota(jnp.int32, (TB, 1), 0)
    valid = row < true_b                              # (TB, 1) bool

    # log_softmax pieces: lse_i = max_i + log(sum_j exp(x_ij - max_i))
    m = jnp.max(x, axis=-1, keepdims=True)                               # (TB, 1)
    lse = m + jnp.log(jnp.sum(jnp.exp(x - m), axis=-1, keepdims=True))   # (TB, 1)

    # -sum_j log_softmax(x)_ij = C * lse_i - sum_j x_ij
    neg_sum_lp = C * lse - jnp.sum(x, axis=-1, keepdims=True)            # (TB, 1)

    # Gather x[i, target[i]] via an inline one-hot compare.  The select runs
    # on the raw (possibly bf16) values: exactly one element per row survives,
    # so summing in the raw dtype is exact; upcast the single value afterwards.
    cls = jax.lax.broadcasted_iota(jnp.int32, (TB, C), 1)
    picked_raw = jnp.where(cls == t, raw, jnp.zeros_like(raw))           # (TB, C)
    picked = jnp.sum(picked_raw, axis=-1, keepdims=True).astype(jnp.float32)
    nll_row = lse - picked                            # -log_softmax at target

    # True selects (not multiply-by-mask) so garbage/NaN in padded rows
    # cannot propagate into the partial sums.
    loss_part = jnp.sum(jnp.where(valid, neg_sum_lp, 0.0))
    nll_part = jnp.sum(jnp.where(valid, nll_row, 0.0))

    # Single lane-dense partial-sum writeback: loss in lane 0, nll in lane 1.
    lane = jax.lax.broadcasted_iota(jnp.int32, (1, 8, 128), 2)
    out_ref[...] = jnp.where(lane == 0, loss_part,
                             jnp.where(lane == 1, nll_part, 0.0))


def _pick_tile_b(B, C, dtype_bytes):
    """Batch tile sized from per-step DMA volume, capped by a VMEM live-set estimate.

    - Target ~4 MiB of preds (in the INPUT dtype) streamed per grid step so the
      ~0.35 us fixed per-step overhead is negligible (mem-bound roofline).
    - Hard cap from the real live set (double-buffered in-dtype preds plus
      ~3 f32-sized temps for x / exp(x-m) / one-hot path), kept under ~40 MiB
      so it fits v7x's 64 MiB/TC VMEM below the 48 MiB scoped limit.
    - If a single tile would cover the whole batch but B >= 16, split into two
      tiles so the parallel grid axis can feed both v7x TensorCores.
    """
    target_dma_bytes = 4 * 1024 * 1024
    vmem_live_budget = 40 * 1024 * 1024
    per_row_live = 2 * C * dtype_bytes + 3 * C * 4
    tb_dma = target_dma_bytes // max(1, C * dtype_bytes)
    tb_vmem = vmem_live_budget // max(1, per_row_live)
    tb = min(tb_dma, tb_vmem)
    tb = max(8, (tb // 8) * 8)    # sublane alignment

    if tb >= B:
        if B >= 16:
            half = ((B + 1) // 2 + 7) // 8 * 8   # ceil(B/2) rounded up to 8
            if half < B:
                return half                       # 2 tiles -> both TCs get work
        return B                                  # single tile; block == full dim is legal
    return tb


def label_smoothing_loss(preds, target, smoothing=0.06, tile_b=None):
    """preds: (B, C) float (any dtype), target: (B,) int -> scalar float32 loss."""
    B, C = preds.shape
    t2 = target.astype(jnp.int32).reshape(B, 1)
    dtype_bytes = jnp.dtype(preds.dtype).itemsize

    if tile_b is not None:
        tb = min(int(tile_b), B)
        if tb < B:
            tb = max(8, (tb // 8) * 8)
    else:
        tb = _pick_tile_b(B, C, dtype_bytes)
    num_tiles = pl.cdiv(B, tb)

    kernel = functools.partial(_label_smoothing_partial_kernel, true_b=B)

    parts = pl.pallas_call(
        kernel,
        out_shape=jax.ShapeDtypeStruct((num_tiles, 8, 128), jnp.float32),
        grid=(num_tiles,),
        in_specs=[
            pl.BlockSpec((tb, C), lambda i: (i, 0)),   # preds, original dtype
            pl.BlockSpec((tb, 1), lambda i: (i, 0)),   # target ids
        ],
        out_specs=pl.BlockSpec((1, 8, 128), lambda i: (i, 0, 0)),
        compiler_params=pltpu.CompilerParams(
            dimension_semantics=("parallel",),
            vmem_limit_bytes=48 * 1024 * 1024,
        ),
    )(preds, t2)

    # Tiny finalize in plain JAX (mean over the true batch size).
    loss_mean = jnp.sum(parts[:, 0, 0]) / B
    nll_mean = jnp.sum(parts[:, 0, 1]) / B
    return smoothing * (loss_mean / C) + (1.0 - smoothing) * nll_mean


def _reference(preds, target, smoothing=0.06):
    # Pure-JAX reference mirroring the PyTorch module (f32 math).
    preds = preds.astype(jnp.float32)
    n = preds.shape[-1]
    log_preds = jax.nn.log_softmax(preds, axis=-1)
    loss = jnp.mean(-jnp.sum(log_preds, axis=-1))
    nll = jnp.mean(-jnp.take_along_axis(log_preds, target[:, None], axis=-1)[:, 0])
    return smoothing * (loss / n) + (1.0 - smoothing) * nll


if __name__ == "__main__":
    key = jax.random.PRNGKey(0)
    k1, k2, k3, k4, k5, k6 = jax.random.split(key, 6)

    # 1) Small shapes consistent with the module: (B, C) logits + int targets.
    B, C = 8, 32
    preds = jax.random.normal(k1, (B, C), dtype=jnp.float32)
    target = jax.random.randint(k2, (B,), 0, C, dtype=jnp.int32)
    out = jax.block_until_ready(label_smoothing_loss(preds, target, smoothing=0.06))
    ref = _reference(preds, target, smoothing=0.06)
    assert jnp.allclose(out, ref, rtol=1e-5, atol=1e-5), (out, ref)

    # 2) Auto tile picker splits B=20 into 2 tiles (16 + ragged 4) -> exercises
    #    the megacore split and the masked ragged final tile.
    B2, C2 = 20, 128
    preds2 = jax.random.normal(k3, (B2, C2), dtype=jnp.float32)
    target2 = jax.random.randint(k4, (B2,), 0, C2, dtype=jnp.int32)
    out2 = jax.block_until_ready(label_smoothing_loss(preds2, target2, smoothing=0.06))
    ref2 = _reference(preds2, target2, smoothing=0.06)
    assert jnp.allclose(out2, ref2, rtol=1e-5, atol=1e-5), (out2, ref2)

    # 3) bf16 inputs with an explicit small tile (3 tiles, ragged last) ->
    #    exercises the raw-dtype gather path and cast-on-load.
    preds3 = jax.random.normal(k5, (B2, C2), dtype=jnp.float32).astype(jnp.bfloat16)
    target3 = jax.random.randint(k6, (B2,), 0, C2, dtype=jnp.int32)
    out3 = jax.block_until_ready(
        label_smoothing_loss(preds3, target3, smoothing=0.06, tile_b=8))
    ref3 = _reference(preds3, target3, smoothing=0.06)
    assert jnp.allclose(out3, ref3, rtol=1e-5, atol=1e-5), (out3, ref3)

    print("KERNEL_OK")
</pallas_src>

<mosaic_0001>
module attributes {stable_mosaic.version = 11 : i64} {
  func.func @_label_smoothing_partial_kernel(%arg0: i32, %arg1: memref<8x32xf32, #tpu.memory_space<vmem>>, %arg2: memref<8x1xi32, #tpu.memory_space<vmem>>, %arg3: memref<1x8x128xf32, #tpu.memory_space<vmem>>) attributes {dimension_semantics = [#tpu.dimension_semantics<parallel>], iteration_bounds = array<i64: 1>, scalar_prefetch = 0 : i64, scratch_operands = 0 : i64, tpu.core_type = #tpu.core_type<tc>, window_params = [{transform_indices = @transform_0, window_bounds = array<i64: 8, 32>}, {transform_indices = @transform_1, window_bounds = array<i64: 8, 1>}, {transform_indices = @transform_2, window_bounds = array<i64: 1, 8, 128>}]} {
    %c0 = arith.constant 0 : index
    %c0_0 = arith.constant 0 : index
    %0 = vector.load %arg1[%c0, %c0_0] : memref<8x32xf32, #tpu.memory_space<vmem>>, vector<8x32xf32>
    %c0_1 = arith.constant 0 : index
    %c0_2 = arith.constant 0 : index
    %1 = vector.load %arg2[%c0_1, %c0_2] : memref<8x1xi32, #tpu.memory_space<vmem>>, vector<8x1xi32>
    %c8_i32 = arith.constant 8 : i32
    %2 = arith.muli %arg0, %c8_i32 : i32
    %3 = tpu.iota {dimensions = array<i32: 0>} : vector<8x1xi32>
    %4 = vector.broadcast %2 : i32 to vector<8x1xi32>
    %5 = arith.addi %4, %3 : vector<8x1xi32>
    %c8_i32_3 = arith.constant 8 : i32
    %6 = vector.broadcast %c8_i32_3 : i32 to vector<8x1xi32>
    %7 = arith.cmpi slt, %5, %6 : vector<8x1xi32>
    %cst = arith.constant dense<0xFF800000> : vector<8xf32>
    %8 = vector.multi_reduction <maximumf>, %0, %cst [1] : vector<8x32xf32> to vector<8xf32>
    %9 = vector.shape_cast %8 : vector<8xf32> to vector<8x1xf32>
    %10 = vector.broadcast %9 : vector<8x1xf32> to vector<8x32xf32>
    %11 = arith.subf %0, %10 : vector<8x32xf32>
    %12 = math.exp %11 : vector<8x32xf32>
    %cst_4 = arith.constant dense<0.000000e+00> : vector<8xf32>
    %13 = vector.multi_reduction <add>, %12, %cst_4 [1] : vector<8x32xf32> to vector<8xf32>
    %14 = vector.shape_cast %13 : vector<8xf32> to vector<8x1xf32>
    %15 = math.log %14 : vector<8x1xf32>
    %16 = arith.addf %9, %15 : vector<8x1xf32>
    %cst_5 = arith.constant 3.200000e+01 : f32
    %17 = vector.broadcast %cst_5 : f32 to vector<8x1xf32>
    %18 = arith.mulf %17, %16 : vector<8x1xf32>
    %cst_6 = arith.constant dense<0.000000e+00> : vector<8xf32>
    %19 = vector.multi_reduction <add>, %0, %cst_6 [1] : vector<8x32xf32> to vector<8xf32>
    %20 = vector.shape_cast %19 : vector<8xf32> to vector<8x1xf32>
    %21 = arith.subf %18, %20 : vector<8x1xf32>
    %22 = tpu.iota {dimensions = array<i32: 1>} : vector<8x32xi32>
    %23 = vector.broadcast %1 : vector<8x1xi32> to vector<8x32xi32>
    %24 = arith.cmpi eq, %22, %23 : vector<8x32xi32>
    %cst_7 = arith.constant 0.000000e+00 : f32
    %25 = vector.broadcast %cst_7 : f32 to vector<8x32xf32>
    %26 = arith.select %24, %0, %25 : vector<8x32xi1>, vector<8x32xf32>
    %cst_8 = arith.constant dense<0.000000e+00> : vector<8xf32>
    %27 = vector.multi_reduction <add>, %26, %cst_8 [1] : vector<8x32xf32> to vector<8xf32>
    %28 = vector.shape_cast %27 : vector<8xf32> to vector<8x1xf32>
    %29 = arith.subf %16, %28 : vector<8x1xf32>
    %cst_9 = arith.constant 0.000000e+00 : f32
    %30 = vector.broadcast %cst_9 : f32 to vector<8x1xf32>
    %31 = arith.select %7, %21, %30 : vector<8x1xi1>, vector<8x1xf32>
    %32 = vector.shape_cast %31 : vector<8x1xf32> to vector<1x8x1xf32>
    %cst_10 = arith.constant dense<0.000000e+00> : vector<1xf32>
    %33 = vector.multi_reduction <add>, %32, %cst_10 [1, 2] : vector<1x8x1xf32> to vector<1xf32>
    %34 = vector.shape_cast %33 : vector<1xf32> to vector<1x1x1xf32>
    %35 = vector.extract %34[0, 0, 0] : f32 from vector<1x1x1xf32>
    %cst_11 = arith.constant 0.000000e+00 : f32
    %36 = vector.broadcast %cst_11 : f32 to vector<8x1xf32>
    %37 = arith.select %7, %29, %36 : vector<8x1xi1>, vector<8x1xf32>
    %38 = vector.shape_cast %37 : vector<8x1xf32> to vector<1x8x1xf32>
    %cst_12 = arith.constant dense<0.000000e+00> : vector<1xf32>
    %39 = vector.multi_reduction <add>, %38, %cst_12 [1, 2] : vector<1x8x1xf32> to vector<1xf32>
    %40 = vector.shape_cast %39 : vector<1xf32> to vector<1x1x1xf32>
    %41 = vector.extract %40[0, 0, 0] : f32 from vector<1x1x1xf32>
    %42 = tpu.iota {dimensions = array<i32: 2>} : vector<1x8x128xi32>
    %c0_i32 = arith.constant 0 : i32
    %43 = vector.broadcast %c0_i32 : i32 to vector<1x8x128xi32>
    %44 = arith.cmpi eq, %42, %43 : vector<1x8x128xi32>
    %c1_i32 = arith.constant 1 : i32
    %45 = vector.broadcast %c1_i32 : i32 to vector<1x8x128xi32>
    %46 = arith.cmpi eq, %42, %45 : vector<1x8x128xi32>
    %cst_13 = arith.constant 0.000000e+00 : f32
    %47 = vector.broadcast %41 : f32 to vector<1x8x128xf32>
    %48 = vector.broadcast %cst_13 : f32 to vector<1x8x128xf32>
    %49 = arith.select %46, %47, %48 : vector<1x8x128xi1>, vector<1x8x128xf32>
    %50 = vector.broadcast %35 : f32 to vector<1x8x128xf32>
    %51 = arith.select %44, %50, %49 : vector<1x8x128xi1>, vector<1x8x128xf32>
    %c0_14 = arith.constant 0 : index
    %c0_15 = arith.constant 0 : index
    %c0_16 = arith.constant 0 : index
    %52 = vector.load %arg3[%c0_14, %c0_15, %c0_16] : memref<1x8x128xf32, #tpu.memory_space<vmem>>, vector<1x8x128xf32>
    tpu.vector_store %arg3[%c0_14, %c0_15, %c0_16], %51 {strides = array<i32>} : memref<1x8x128xf32, #tpu.memory_space<vmem>>, vector<1x8x128xf32>,
    return
  }
  func.func @transform_0(%arg0: i32) -> (i32, i32) {
    %c0_i32 = arith.constant 0 : i32
    %c0_i32_0 = arith.constant 0 : i32
    return %arg0, %c0_i32 : i32, i32
  }
  func.func @transform_1(%arg0: i32) -> (i32, i32) {
    %c0_i32 = arith.constant 0 : i32
    %c0_i32_0 = arith.constant 0 : i32
    return %arg0, %c0_i32 : i32, i32
  }
  func.func @transform_2(%arg0: i32) -> (i32, i32, i32) {
    %c0_i32 = arith.constant 0 : i32
    %c0_i32_0 = arith.constant 0 : i32
    %c0_i32_1 = arith.constant 0 : i32
    return %arg0, %c0_i32, %c0_i32_0 : i32, i32, i32
  }
}

</mosaic_0001>

<bundles_post_ra>
// kernel: tpu_custom_call.1
= control target key start
LH: loop header
LB: loop body
LE: loop exit
PB: predicated region body
PF: predicated region fallthrough
CT: control target
= control target key end

     0   :  { %vm20_vm0 = vcmask 261120   ;;  %s167_s0 = inlined_call_operand.vmem [shape: f32[8,32], index: 0, kind: input, shape index: {}]   ;;  %s168_s1 = inlined_call_operand.vmem [shape: s32[8,1], index: 1, kind: input, shape index: {}]   ;;  %s169_s2 = inlined_call_operand.hbm [shape: f32[1,8,128], index: 2, kind: output, shape index: {}]  }
   0x1   :  { %v12_v0 = vld [vmem:[%s167_s0] sm:$0xff] }
   0x2   :  { %7 = vsyncpa [#allocation3], 0  ;;  %v21_v1 = vsel %vm20_vm0, %v12_v0, -inf  ;;  %v128_v2 = vmov 0   ;;  %v13_v3 = vld [vmem:[%s168_s1] sm:$0xff]  ;;  %v38_v7 = vlaneseq  ;;  %v34_v12 = vsel %vm20_vm0, %v12_v0, 0.0 }
   0x3   :  { %99 = vset.pattern.permute.xlu0 %v128_v2  ;;  %vm50_vm2 = vcmask 7168   ;;  %s129_s1 = smov [#allocation2]  }
   0x4   :  { %22 = vmax.xlane.f32.xlu0 %v21_v1  ;;  %v39_v8 = vand.u32 127, %v38_v7  ;;  %s85_s13 = sshll.u32 %s129_s1, 4  ;;  %s86_s13 = int_to_ptr.vmem [resolvable:$true] %s85_s13 }
   0x5   :  { %s104_s15 = scalar_lea.vmem %s86_s13, 128  ;;  %p109_p1 = scmp.lt.s32.totalorder %s86_s13, %s86_s13 }
   0x6   :  { %vm73_vm3 = vcmp.eq.s32.totalorder %v39_v8, 1  ;;  %vm72_vm4 = vcmp.eq.s32.totalorder %v39_v8, 0  ;;  %p105_p0 = scmp.ne.s32.totalorder %s86_s13, %s104_s15  ;;  %p110_p2 = scmp.lt.s32.totalorder %s104_s15, %s104_s15 }
   0x8   :  { %p111_p3 = por %p110_p2, %p109_p1 }
   0xa   :  { %p112_p4 = pnand %p111_p3, %p105_p0 }
  0x1a   :  { %41 = vperm.xlu0 %99, %v13_v3  }
  0x91   :  { %v23_v4 = vpop.xlane.xlu0 %22 }
  0x92   :  { %v24_v5 = vsub.f32 %v12_v0, %v23_v4 }
  0x94   :  { %v25_v6 = vmul.f32 1.442695, %v24_v5 }
  0x96   :  { %100 = vpow2.f32 %v25_v6 }
  0x99   :  { %v42_v9 = vpop.permute.xlu0 %41 }
  0x9a   :  { %vm43_vm1 = vcmp.eq.s32.totalorder %v39_v8, %v42_v9 }
  0x9b   :  { %v44_v13 = vsel %vm43_vm1, %v12_v0, 0.0 }
  0x9c   :  { %v45_v14 = vsel %vm20_vm0, %v44_v13, 0.0 }
  0xa0   :  { %v101_v10 = vpop.eup %100 }
  0xa1   :  { %v27_v11 = vsel %vm20_vm0, %v101_v10, 0.0 }
  0xa2   :  { %28 = vadd.xlane.f32.xlu1 %v27_v11 }
  0xa6   :  { %35 = vadd.xlane.f32.xlu1 %v34_v12 }
  0xaa   :  { %46 = vadd.xlane.f32.xlu1 %v45_v14 }
 0x12f   :  { %v29_v15 = vpop.xlane.xlu1 %28 }
 0x130   :  { %102 = vlog2.f32 %v29_v15 }
 0x133   :  { %v36_v17 = vpop.xlane.xlu1 %35 }
 0x137   :  { %v47_v21 = vpop.xlane.xlu1 %46 }
 0x13a   :  { %v103_v16 = vpop.eup %102 }
 0x13b   :  { %v31_v18 = vmul.f32 0.6931472, %v103_v16 }
 0x13d   :  { %v32_v19 = vadd.f32 %v31_v18, %v23_v4 }
 0x13f   :  { %v33_v20 = vmul.f32 32.0, %v32_v19  ;;  %v48_v23 = vsub.f32 %v32_v19, %v47_v21 }
 0x141   :  { %v37_v22 = vsub.f32 %v33_v20, %v36_v17  ;;  %v62_v25 = vsel %vm50_vm2, %v48_v23, 0.0 }
 0x143   :  { %v51_v24 = vsel %vm50_vm2, %v37_v22, 0.0 }
 0x144   :  { %52 = vadd.xlane.f32.xlu1 %v51_v24 }
 0x148   :  { %63 = vadd.xlane.f32.xlu1 %v62_v25 }
 0x1d1   :  { %v53_v26 = vpop.xlane.xlu1 %52 }
 0x1d2   :  { %v54_v27 = vrot.slane %v53_v26, 4 }
 0x1d4   :  { %v55_v28 = vadd.f32 %v54_v27, %v53_v26 }
 0x1d5   :  { %v64_v29 = vpop.xlane.xlu1 %63 }
 0x1d6   :  { %v56_v30 = vrot.slane %v55_v28, 2  ;;  %v65_v31 = vrot.slane %v64_v29, 4 }
 0x1d8   :  { %v66_v32 = vadd.f32 %v65_v31, %v64_v29  ;;  %v57_v33 = vadd.f32 %v56_v30, %v55_v28 }
 0x1da   :  { %v67_v34 = vrot.slane %v66_v32, 2  ;;  %v58_v35 = vrot.slane %v57_v33, 1 }
 0x1dc   :  { %v68_v36 = vadd.f32 %v67_v34, %v66_v32  ;;  %v59_v37 = vadd.f32 %v58_v35, %v57_v33 }
 0x1de   :  { %93 = vpush %v59_v37  ;;  %v69_v38 = vrot.slane %v68_v36, 1 }
 0x1e0   :  { %v70_v39 = vadd.f32 %v69_v38, %v68_v36 }
 0x1e2   :  { %95 = vpush %v70_v39 }
 0x20f   :  { %s94_s0 = spop %93 }
 0x210   :  { %v76_v41 = vstv %s94_s0 }
 0x213   :  { %s96_s14 = spop %95 }
 0x214   :  { %v74_v40 = vstv %s96_s14 }
 0x215   :  { %v75_v42 = vsel %vm73_vm3, %v74_v40, 0.0 }
 0x216   :  { %v77_v43 = vsel %vm72_vm4, %v76_v41, %v75_v42 }
 0x217   :  { %78 = vst [vmem:[#allocation2] sm:$0xff] %v77_v43 }
 0x218   :  { %115 = shalt.err (!%p112_p4)
}
 0x219   :  { %s116_s18 = scalar_lea.hbm %s169_s2, 128 }
 0x21a   :  { %p117_p5 = scmp.ne.s32.totalorder %s169_s2, %s116_s18  ;;  %p120_p6 = scmp.lt.u32.totalorder %s116_s18, %s169_s2 }
 0x21c   :  { %p122_p7 = pnand %p120_p6, %p117_p5 }
 0x21e   :  { %125 = shalt.err (!%p122_p7)
}
 0x21f   :  { %88 = dma.vmem_to_hbm [thread:$0]  %s86_s13, 128, %s169_s2, [#allocation3]  }
 0x220   :  { %126 = dma.done.wait [#allocation3], 128  }
 0x221   :  { %127 = vsyncadd [#allocation3], 4294967168 }
 0x222   :  { %92 = vsyncpa [#allocation3], 1 }

</bundles_post_ra>
